<compile_context>
chip_gen: v7x
topology: tpu7x:2x2x1
jax: 0.10.0
libtpu: 0.0.40
codegen_flags: <defaults>
</compile_context>

<pallas_src>
import jax
import jax.numpy as jnp
from jax.experimental import pallas as pl
from jax.experimental.pallas import tpu as pltpu  # noqa: F401  (TPU backend)

# --------------------------------------------------------------------------
# Model dimensions
# --------------------------------------------------------------------------
NTOKEN = 50        # vocabulary size (emb table has NTOKEN+1 rows, last = pad)
EMB_DIM = 32       # config.emb_dim
LSTM_OUT = 32      # config.lstm_out (unidirectional -> qfeat_dim = LSTM_OUT)
NUM_HIDDEN = 64    # config.num_hidden
NUM_CLASSES = 16   # config.num_classes
B = 2              # batch
T = 8              # max question length


# --------------------------------------------------------------------------
# Fused Pallas kernel: embedding + LSTM (packed-seq semantics) + classifier
# --------------------------------------------------------------------------
def q_only_fused_kernel(q_ref, ql_ref, emb_ref, wx_ref, wh_ref, bg_ref,
                        w1_ref, b1_ref, w2_ref, b2_ref, out_ref):
    """q_ref  : (T*B, 1) int32 time-major token ids (row n = t*B + b)
       ql_ref : (B, 1)   int32 question lengths
       emb_ref: (Vp, E)  embedding table (rows zero-padded to Vp)
       wx_ref : (E, 4H)  input->gates weights (i,f,g,o PyTorch gate order)
       wh_ref : (H, 4H)  hidden->gates weights
       bg_ref : (1, 4H)  combined bias (b_ih + b_hh)
       w1_ref : (H, NH), b1_ref: (1, NH)   classifier lin1
       w2_ref : (NH, NC), b2_ref: (1, NC)  classifier head
       out_ref: (B, NC) predictions
    """
    Bn = ql_ref.shape[0]
    TB = q_ref.shape[0]
    Tn = TB // Bn
    H = wh_ref.shape[0]
    V = emb_ref.shape[0]

    # ---- Embedding gather + hoisted input projection (done once, on MXU) ----
    # one-hot(tokens) @ (emb @ Wx) == emb[tokens] @ Wx  (exact row selection)
    tok = q_ref[...]                                              # (T*B, 1)
    vocab = jax.lax.broadcasted_iota(jnp.int32, (TB, V), 1)
    onehot = (tok == vocab).astype(jnp.float32)                   # (T*B, V)
    emb_proj = jnp.dot(emb_ref[...], wx_ref[...],
                       preferred_element_type=jnp.float32)        # (V, 4H)
    xw_all = jnp.dot(onehot, emb_proj,
                     preferred_element_type=jnp.float32) + bg_ref[...]  # (T*B, 4H)

    ql_vec = ql_ref[...]                                          # (B, 1) int32
    wh = wh_ref[...]                                              # (H, 4H)

    h = jnp.zeros((Bn, H), jnp.float32)
    c = jnp.zeros((Bn, H), jnp.float32)

    # Fully-unrolled static time loop (Tn = 8): per step only one small
    # (B,H)x(H,4H) MXU pass plus elementwise gate math on the VPU/EUP.
    for t in range(Tn):
        gates = xw_all[t * Bn:(t + 1) * Bn, :] + jnp.dot(
            h, wh, preferred_element_type=jnp.float32)            # (B, 4H)
        i_g = jax.nn.sigmoid(gates[:, 0 * H:1 * H])
        f_g = jax.nn.sigmoid(gates[:, 1 * H:2 * H])
        g_g = jnp.tanh(gates[:, 2 * H:3 * H])
        o_g = jax.nn.sigmoid(gates[:, 3 * H:4 * H])
        c_new = f_g * c + i_g * g_g
        h_new = o_g * jnp.tanh(c_new)
        # pack_padded_sequence semantics: freeze h/c once t >= q_len[b]
        valid = ql_vec > t                                        # (B,1) -> bcast over H
        h = jnp.where(valid, h_new, h)
        c = jnp.where(valid, c_new, c)

    # ---- Fused classifier: ReLU(h @ W1 + b1) @ W2 + b2 (dropout = identity) ----
    proj = jnp.dot(h, w1_ref[...], preferred_element_type=jnp.float32) + b1_ref[...]
    proj = jnp.maximum(proj, 0.0)
    out_ref[...] = jnp.dot(proj, w2_ref[...],
                           preferred_element_type=jnp.float32) + b2_ref[...]


# --------------------------------------------------------------------------
# Wrapper
# --------------------------------------------------------------------------
def q_only_forward(q, imfeat, ql, params):
    """Q_only.forward: imfeat is ignored (question-only model)."""
    del imfeat
    Bb, Tt = q.shape
    V, _ = params["emb"].shape
    v_pad = ((V + 7) // 8) * 8                     # align one-hot K dim
    emb_padded = jnp.pad(params["emb"], ((0, v_pad - V), (0, 0)))

    # Tiny layout plumbing on 16 ints / small weights (one-time, trivial):
    q_flat = jnp.transpose(q).reshape(Tt * Bb, 1).astype(jnp.int32)  # time-major
    ql_col = ql.reshape(Bb, 1).astype(jnp.int32)

    # TODO(synk): nn.Dropout layers run in eval mode (identity); no RNG dropout.
    return pl.pallas_call(
        q_only_fused_kernel,
        out_shape=jax.ShapeDtypeStruct((Bb, NUM_CLASSES), jnp.float32),
        # No grid / no BlockSpecs: every operand is a single full block in VMEM
        # (total resident footprint ~30 KB, far under any VMEM limit).
    )(q_flat, ql_col, emb_padded,
      params["w_ih"].T, params["w_hh"].T,
      (params["b_ih"] + params["b_hh"])[None, :],
      params["lin1_w"].T, params["lin1_b"][None, :],
      params["cls_w"].T, params["cls_b"][None, :])


# --------------------------------------------------------------------------
# Pure-JAX reference (for correctness check)
# --------------------------------------------------------------------------
def reference_forward(q, ql, params):
    emb = params["emb"][q]
    x_seq = jnp.transpose(emb, (1, 0, 2)).astype(jnp.float32)
    Tt, Bb, _ = x_seq.shape
    H = params["w_hh"].shape[1]
    mask = (jnp.arange(Tt)[:, None] < ql[None, :]).astype(jnp.float32)

    def step(carry, inp):
        h, c = carry
        x_t, m_t = inp
        gates = (x_t @ params["w_ih"].T + h @ params["w_hh"].T
                 + params["b_ih"] + params["b_hh"])
        i_g = jax.nn.sigmoid(gates[:, :H])
        f_g = jax.nn.sigmoid(gates[:, H:2 * H])
        g_g = jnp.tanh(gates[:, 2 * H:3 * H])
        o_g = jax.nn.sigmoid(gates[:, 3 * H:])
        c_new = f_g * c + i_g * g_g
        h_new = o_g * jnp.tanh(c_new)
        m = m_t[:, None] > 0.5
        return (jnp.where(m, h_new, h), jnp.where(m, c_new, c)), None

    (h, _), _ = jax.lax.scan(step,
                             (jnp.zeros((Bb, H)), jnp.zeros((Bb, H))),
                             (x_seq, mask))
    proj = jnp.maximum(h @ params["lin1_w"].T + params["lin1_b"], 0.0)
    return proj @ params["cls_w"].T + params["cls_b"]


# --------------------------------------------------------------------------
# Main
# --------------------------------------------------------------------------
if __name__ == "__main__":
    key = jax.random.PRNGKey(0)
    ks = jax.random.split(key, 12)

    params = {
        "emb":    0.1 * jax.random.normal(ks[0], (NTOKEN + 1, EMB_DIM), jnp.float32),
        "w_ih":   0.1 * jax.random.normal(ks[1], (4 * LSTM_OUT, EMB_DIM), jnp.float32),
        "w_hh":   0.1 * jax.random.normal(ks[2], (4 * LSTM_OUT, LSTM_OUT), jnp.float32),
        "b_ih":   0.1 * jax.random.normal(ks[3], (4 * LSTM_OUT,), jnp.float32),
        "b_hh":   0.1 * jax.random.normal(ks[4], (4 * LSTM_OUT,), jnp.float32),
        "lin1_w": 0.1 * jax.random.normal(ks[5], (NUM_HIDDEN, LSTM_OUT), jnp.float32),
        "lin1_b": 0.1 * jax.random.normal(ks[6], (NUM_HIDDEN,), jnp.float32),
        "cls_w":  0.1 * jax.random.normal(ks[7], (NUM_CLASSES, NUM_HIDDEN), jnp.float32),
        "cls_b":  0.1 * jax.random.normal(ks[8], (NUM_CLASSES,), jnp.float32),
    }

    # Inputs: token ids, pooled image features (unused by Q_only), lengths
    # (sorted descending, as required by pack_padded_sequence).
    q = jax.random.randint(ks[9], (B, T), 0, NTOKEN, dtype=jnp.int32)
    imfeat = jax.random.normal(ks[10], (B, 2048), jnp.float32)
    ql = jnp.array([T, 5], dtype=jnp.int32)

    preds = q_only_forward(q, imfeat, ql, params)
    preds = jax.block_until_ready(preds)

    ref = reference_forward(q, ql, params)
    assert preds.shape == (B, NUM_CLASSES)
    assert jnp.allclose(preds, ref, atol=1e-5, rtol=1e-5), (
        f"max abs err {jnp.max(jnp.abs(preds - ref))}")

    print("KERNEL_OK")
</pallas_src>

<mosaic_0001>
module attributes {stable_mosaic.version = 11 : i64} {
  func.func @q_only_fused_kernel(%arg0: memref<16x1xi32, #tpu.memory_space<vmem>>, %arg1: memref<2x1xi32, #tpu.memory_space<vmem>>, %arg2: memref<56x32xf32, #tpu.memory_space<vmem>>, %arg3: memref<32x128xf32, #tpu.memory_space<vmem>>, %arg4: memref<32x128xf32, #tpu.memory_space<vmem>>, %arg5: memref<1x128xf32, #tpu.memory_space<vmem>>, %arg6: memref<32x64xf32, #tpu.memory_space<vmem>>, %arg7: memref<1x64xf32, #tpu.memory_space<vmem>>, %arg8: memref<64x16xf32, #tpu.memory_space<vmem>>, %arg9: memref<1x16xf32, #tpu.memory_space<vmem>>, %arg10: memref<2x16xf32, #tpu.memory_space<vmem>>) attributes {dimension_semantics = [], scalar_prefetch = 0 : i64, scratch_operands = 0 : i64, tpu.core_type = #tpu.core_type<tc>} {
    %c0 = arith.constant 0 : index
    %c0_0 = arith.constant 0 : index
    %0 = vector.load %arg0[%c0, %c0_0] : memref<16x1xi32, #tpu.memory_space<vmem>>, vector<16x1xi32>
    %1 = tpu.iota {dimensions = array<i32: 1>} : vector<16x56xi32>
    %2 = vector.broadcast %0 : vector<16x1xi32> to vector<16x56xi32>
    %3 = arith.cmpi eq, %2, %1 : vector<16x56xi32>
    %4 = arith.extui %3 : vector<16x56xi1> to vector<16x56xi32>
    %5 = arith.sitofp %4 : vector<16x56xi32> to vector<16x56xf32>
    %c0_1 = arith.constant 0 : index
    %c0_2 = arith.constant 0 : index
    %6 = vector.load %arg2[%c0_1, %c0_2] : memref<56x32xf32, #tpu.memory_space<vmem>>, vector<56x32xf32>
    %c0_3 = arith.constant 0 : index
    %c0_4 = arith.constant 0 : index
    %7 = vector.load %arg3[%c0_3, %c0_4] : memref<32x128xf32, #tpu.memory_space<vmem>>, vector<32x128xf32>
    %cst = arith.constant dense<0.000000e+00> : vector<56x128xf32>
    %8 = tpu.matmul %6, %7, %cst {dimension_numbers = #tpu.dot_dimension_numbers<[1], [0], [0], [1], [0, 0, 1, 1], [], []>} : vector<56x32xf32>, vector<32x128xf32>, vector<56x128xf32> -> vector<56x128xf32>
    %cst_5 = arith.constant dense<0.000000e+00> : vector<16x128xf32>
    %9 = tpu.matmul %5, %8, %cst_5 {dimension_numbers = #tpu.dot_dimension_numbers<[1], [0], [0], [1], [0, 0, 1, 1], [], []>} : vector<16x56xf32>, vector<56x128xf32>, vector<16x128xf32> -> vector<16x128xf32>
    %c0_6 = arith.constant 0 : index
    %c0_7 = arith.constant 0 : index
    %10 = vector.load %arg5[%c0_6, %c0_7] : memref<1x128xf32, #tpu.memory_space<vmem>>, vector<1x128xf32>
    %11 = vector.broadcast %10 : vector<1x128xf32> to vector<16x128xf32>
    %12 = arith.addf %9, %11 : vector<16x128xf32>
    %c0_8 = arith.constant 0 : index
    %c0_9 = arith.constant 0 : index
    %13 = vector.load %arg1[%c0_8, %c0_9] : memref<2x1xi32, #tpu.memory_space<vmem>>, vector<2x1xi32>
    %c0_10 = arith.constant 0 : index
    %c0_11 = arith.constant 0 : index
    %14 = vector.load %arg4[%c0_10, %c0_11] : memref<32x128xf32, #tpu.memory_space<vmem>>, vector<32x128xf32>
    %cst_12 = arith.constant 0.000000e+00 : f32
    %15 = vector.broadcast %cst_12 : f32 to vector<2x32xf32>
    %cst_13 = arith.constant 0.000000e+00 : f32
    %16 = vector.broadcast %cst_13 : f32 to vector<2x32xf32>
    %17 = vector.extract_strided_slice %12 {offsets = [0, 0], sizes = [2, 128], strides = [1, 1]} : vector<16x128xf32> to vector<2x128xf32>
    %cst_14 = arith.constant dense<0.000000e+00> : vector<2x128xf32>
    %18 = tpu.matmul %15, %14, %cst_14 {dimension_numbers = #tpu.dot_dimension_numbers<[1], [0], [0], [1], [0, 0, 1, 1], [], []>} : vector<2x32xf32>, vector<32x128xf32>, vector<2x128xf32> -> vector<2x128xf32>
    %19 = arith.addf %17, %18 : vector<2x128xf32>
    %20 = vector.extract_strided_slice %19 {offsets = [0, 0], sizes = [2, 32], strides = [1, 1]} : vector<2x128xf32> to vector<2x32xf32>
    %21 = arith.negf %20 : vector<2x32xf32>
    %22 = math.exp %21 : vector<2x32xf32>
    %cst_15 = arith.constant 1.000000e+00 : f32
    %23 = vector.broadcast %cst_15 : f32 to vector<2x32xf32>
    %24 = arith.addf %23, %22 : vector<2x32xf32>
    %25 = arith.divf %23, %24 : vector<2x32xf32>
    %26 = vector.extract_strided_slice %19 {offsets = [0, 32], sizes = [2, 32], strides = [1, 1]} : vector<2x128xf32> to vector<2x32xf32>
    %27 = arith.negf %26 : vector<2x32xf32>
    %28 = math.exp %27 : vector<2x32xf32>
    %cst_16 = arith.constant 1.000000e+00 : f32
    %29 = vector.broadcast %cst_16 : f32 to vector<2x32xf32>
    %30 = arith.addf %29, %28 : vector<2x32xf32>
    %31 = arith.divf %29, %30 : vector<2x32xf32>
    %32 = vector.extract_strided_slice %19 {offsets = [0, 64], sizes = [2, 32], strides = [1, 1]} : vector<2x128xf32> to vector<2x32xf32>
    %33 = math.tanh %32 : vector<2x32xf32>
    %34 = vector.extract_strided_slice %19 {offsets = [0, 96], sizes = [2, 32], strides = [1, 1]} : vector<2x128xf32> to vector<2x32xf32>
    %35 = arith.negf %34 : vector<2x32xf32>
    %36 = math.exp %35 : vector<2x32xf32>
    %cst_17 = arith.constant 1.000000e+00 : f32
    %37 = vector.broadcast %cst_17 : f32 to vector<2x32xf32>
    %38 = arith.addf %37, %36 : vector<2x32xf32>
    %39 = arith.divf %37, %38 : vector<2x32xf32>
    %40 = arith.mulf %31, %16 : vector<2x32xf32>
    %41 = arith.mulf %25, %33 : vector<2x32xf32>
    %42 = arith.addf %40, %41 : vector<2x32xf32>
    %43 = math.tanh %42 : vector<2x32xf32>
    %44 = arith.mulf %39, %43 : vector<2x32xf32>
    %c0_i32 = arith.constant 0 : i32
    %45 = vector.broadcast %c0_i32 : i32 to vector<2x1xi32>
    %46 = arith.cmpi sgt, %13, %45 : vector<2x1xi32>
    %47 = vector.shape_cast %46 : vector<2x1xi1> to vector<2x1xi1>
    %48 = vector.broadcast %47 : vector<2x1xi1> to vector<2x32xi1>
    %49 = arith.select %48, %44, %15 : vector<2x32xi1>, vector<2x32xf32>
    %50 = vector.shape_cast %46 : vector<2x1xi1> to vector<2x1xi1>
    %51 = vector.broadcast %50 : vector<2x1xi1> to vector<2x32xi1>
    %52 = arith.select %51, %42, %16 : vector<2x32xi1>, vector<2x32xf32>
    %53 = vector.extract_strided_slice %12 {offsets = [2, 0], sizes = [2, 128], strides = [1, 1]} : vector<16x128xf32> to vector<2x128xf32>
    %cst_18 = arith.constant dense<0.000000e+00> : vector<2x128xf32>
    %54 = tpu.matmul %49, %14, %cst_18 {dimension_numbers = #tpu.dot_dimension_numbers<[1], [0], [0], [1], [0, 0, 1, 1], [], []>} : vector<2x32xf32>, vector<32x128xf32>, vector<2x128xf32> -> vector<2x128xf32>
    %55 = arith.addf %53, %54 : vector<2x128xf32>
    %56 = vector.extract_strided_slice %55 {offsets = [0, 0], sizes = [2, 32], strides = [1, 1]} : vector<2x128xf32> to vector<2x32xf32>
    %57 = arith.negf %56 : vector<2x32xf32>
    %58 = math.exp %57 : vector<2x32xf32>
    %cst_19 = arith.constant 1.000000e+00 : f32
    %59 = vector.broadcast %cst_19 : f32 to vector<2x32xf32>
    %60 = arith.addf %59, %58 : vector<2x32xf32>
    %61 = arith.divf %59, %60 : vector<2x32xf32>
    %62 = vector.extract_strided_slice %55 {offsets = [0, 32], sizes = [2, 32], strides = [1, 1]} : vector<2x128xf32> to vector<2x32xf32>
    %63 = arith.negf %62 : vector<2x32xf32>
    %64 = math.exp %63 : vector<2x32xf32>
    %cst_20 = arith.constant 1.000000e+00 : f32
    %65 = vector.broadcast %cst_20 : f32 to vector<2x32xf32>
    %66 = arith.addf %65, %64 : vector<2x32xf32>
    %67 = arith.divf %65, %66 : vector<2x32xf32>
    %68 = vector.extract_strided_slice %55 {offsets = [0, 64], sizes = [2, 32], strides = [1, 1]} : vector<2x128xf32> to vector<2x32xf32>
    %69 = math.tanh %68 : vector<2x32xf32>
    %70 = vector.extract_strided_slice %55 {offsets = [0, 96], sizes = [2, 32], strides = [1, 1]} : vector<2x128xf32> to vector<2x32xf32>
    %71 = arith.negf %70 : vector<2x32xf32>
    %72 = math.exp %71 : vector<2x32xf32>
    %cst_21 = arith.constant 1.000000e+00 : f32
    %73 = vector.broadcast %cst_21 : f32 to vector<2x32xf32>
    %74 = arith.addf %73, %72 : vector<2x32xf32>
    %75 = arith.divf %73, %74 : vector<2x32xf32>
    %76 = arith.mulf %67, %52 : vector<2x32xf32>
    %77 = arith.mulf %61, %69 : vector<2x32xf32>
    %78 = arith.addf %76, %77 : vector<2x32xf32>
    %79 = math.tanh %78 : vector<2x32xf32>
    %80 = arith.mulf %75, %79 : vector<2x32xf32>
    %c1_i32 = arith.constant 1 : i32
    %81 = vector.broadcast %c1_i32 : i32 to vector<2x1xi32>
    %82 = arith.cmpi sgt, %13, %81 : vector<2x1xi32>
    %83 = vector.shape_cast %82 : vector<2x1xi1> to vector<2x1xi1>
    %84 = vector.broadcast %83 : vector<2x1xi1> to vector<2x32xi1>
    %85 = arith.select %84, %80, %49 : vector<2x32xi1>, vector<2x32xf32>
    %86 = vector.shape_cast %82 : vector<2x1xi1> to vector<2x1xi1>
    %87 = vector.broadcast %86 : vector<2x1xi1> to vector<2x32xi1>
    %88 = arith.select %87, %78, %52 : vector<2x32xi1>, vector<2x32xf32>
    %89 = vector.extract_strided_slice %12 {offsets = [4, 0], sizes = [2, 128], strides = [1, 1]} : vector<16x128xf32> to vector<2x128xf32>
    %cst_22 = arith.constant dense<0.000000e+00> : vector<2x128xf32>
    %90 = tpu.matmul %85, %14, %cst_22 {dimension_numbers = #tpu.dot_dimension_numbers<[1], [0], [0], [1], [0, 0, 1, 1], [], []>} : vector<2x32xf32>, vector<32x128xf32>, vector<2x128xf32> -> vector<2x128xf32>
    %91 = arith.addf %89, %90 : vector<2x128xf32>
    %92 = vector.extract_strided_slice %91 {offsets = [0, 0], sizes = [2, 32], strides = [1, 1]} : vector<2x128xf32> to vector<2x32xf32>
    %93 = arith.negf %92 : vector<2x32xf32>
    %94 = math.exp %93 : vector<2x32xf32>
    %cst_23 = arith.constant 1.000000e+00 : f32
    %95 = vector.broadcast %cst_23 : f32 to vector<2x32xf32>
    %96 = arith.addf %95, %94 : vector<2x32xf32>
    %97 = arith.divf %95, %96 : vector<2x32xf32>
    %98 = vector.extract_strided_slice %91 {offsets = [0, 32], sizes = [2, 32], strides = [1, 1]} : vector<2x128xf32> to vector<2x32xf32>
    %99 = arith.negf %98 : vector<2x32xf32>
    %100 = math.exp %99 : vector<2x32xf32>
    %cst_24 = arith.constant 1.000000e+00 : f32
    %101 = vector.broadcast %cst_24 : f32 to vector<2x32xf32>
    %102 = arith.addf %101, %100 : vector<2x32xf32>
    %103 = arith.divf %101, %102 : vector<2x32xf32>
    %104 = vector.extract_strided_slice %91 {offsets = [0, 64], sizes = [2, 32], strides = [1, 1]} : vector<2x128xf32> to vector<2x32xf32>
    %105 = math.tanh %104 : vector<2x32xf32>
    %106 = vector.extract_strided_slice %91 {offsets = [0, 96], sizes = [2, 32], strides = [1, 1]} : vector<2x128xf32> to vector<2x32xf32>
    %107 = arith.negf %106 : vector<2x32xf32>
    %108 = math.exp %107 : vector<2x32xf32>
    %cst_25 = arith.constant 1.000000e+00 : f32
    %109 = vector.broadcast %cst_25 : f32 to vector<2x32xf32>
    %110 = arith.addf %109, %108 : vector<2x32xf32>
    %111 = arith.divf %109, %110 : vector<2x32xf32>
    %112 = arith.mulf %103, %88 : vector<2x32xf32>
    %113 = arith.mulf %97, %105 : vector<2x32xf32>
    %114 = arith.addf %112, %113 : vector<2x32xf32>
    %115 = math.tanh %114 : vector<2x32xf32>
    %116 = arith.mulf %111, %115 : vector<2x32xf32>
    %c2_i32 = arith.constant 2 : i32
    %117 = vector.broadcast %c2_i32 : i32 to vector<2x1xi32>
    %118 = arith.cmpi sgt, %13, %117 : vector<2x1xi32>
    %119 = vector.shape_cast %118 : vector<2x1xi1> to vector<2x1xi1>
    %120 = vector.broadcast %119 : vector<2x1xi1> to vector<2x32xi1>
    %121 = arith.select %120, %116, %85 : vector<2x32xi1>, vector<2x32xf32>
    %122 = vector.shape_cast %118 : vector<2x1xi1> to vector<2x1xi1>
    %123 = vector.broadcast %122 : vector<2x1xi1> to vector<2x32xi1>
    %124 = arith.select %123, %114, %88 : vector<2x32xi1>, vector<2x32xf32>
    %125 = vector.extract_strided_slice %12 {offsets = [6, 0], sizes = [2, 128], strides = [1, 1]} : vector<16x128xf32> to vector<2x128xf32>
    %cst_26 = arith.constant dense<0.000000e+00> : vector<2x128xf32>
    %126 = tpu.matmul %121, %14, %cst_26 {dimension_numbers = #tpu.dot_dimension_numbers<[1], [0], [0], [1], [0, 0, 1, 1], [], []>} : vector<2x32xf32>, vector<32x128xf32>, vector<2x128xf32> -> vector<2x128xf32>
    %127 = arith.addf %125, %126 : vector<2x128xf32>
    %128 = vector.extract_strided_slice %127 {offsets = [0, 0], sizes = [2, 32], strides = [1, 1]} : vector<2x128xf32> to vector<2x32xf32>
    %129 = arith.negf %128 : vector<2x32xf32>
    %130 = math.exp %129 : vector<2x32xf32>
    %cst_27 = arith.constant 1.000000e+00 : f32
    %131 = vector.broadcast %cst_27 : f32 to vector<2x32xf32>
    %132 = arith.addf %131, %130 : vector<2x32xf32>
    %133 = arith.divf %131, %132 : vector<2x32xf32>
    %134 = vector.extract_strided_slice %127 {offsets = [0, 32], sizes = [2, 32], strides = [1, 1]} : vector<2x128xf32> to vector<2x32xf32>
    %135 = arith.negf %134 : vector<2x32xf32>
    %136 = math.exp %135 : vector<2x32xf32>
    %cst_28 = arith.constant 1.000000e+00 : f32
    %137 = vector.broadcast %cst_28 : f32 to vector<2x32xf32>
    %138 = arith.addf %137, %136 : vector<2x32xf32>
    %139 = arith.divf %137, %138 : vector<2x32xf32>
    %140 = vector.extract_strided_slice %127 {offsets = [0, 64], sizes = [2, 32], strides = [1, 1]} : vector<2x128xf32> to vector<2x32xf32>
    %141 = math.tanh %140 : vector<2x32xf32>
    %142 = vector.extract_strided_slice %127 {offsets = [0, 96], sizes = [2, 32], strides = [1, 1]} : vector<2x128xf32> to vector<2x32xf32>
    %143 = arith.negf %142 : vector<2x32xf32>
    %144 = math.exp %143 : vector<2x32xf32>
    %cst_29 = arith.constant 1.000000e+00 : f32
    %145 = vector.broadcast %cst_29 : f32 to vector<2x32xf32>
    %146 = arith.addf %145, %144 : vector<2x32xf32>
    %147 = arith.divf %145, %146 : vector<2x32xf32>
    %148 = arith.mulf %139, %124 : vector<2x32xf32>
    %149 = arith.mulf %133, %141 : vector<2x32xf32>
    %150 = arith.addf %148, %149 : vector<2x32xf32>
    %151 = math.tanh %150 : vector<2x32xf32>
    %152 = arith.mulf %147, %151 : vector<2x32xf32>
    %c3_i32 = arith.constant 3 : i32
    %153 = vector.broadcast %c3_i32 : i32 to vector<2x1xi32>
    %154 = arith.cmpi sgt, %13, %153 : vector<2x1xi32>
    %155 = vector.shape_cast %154 : vector<2x1xi1> to vector<2x1xi1>
    %156 = vector.broadcast %155 : vector<2x1xi1> to vector<2x32xi1>
    %157 = arith.select %156, %152, %121 : vector<2x32xi1>, vector<2x32xf32>
    %158 = vector.shape_cast %154 : vector<2x1xi1> to vector<2x1xi1>
    %159 = vector.broadcast %158 : vector<2x1xi1> to vector<2x32xi1>
    %160 = arith.select %159, %150, %124 : vector<2x32xi1>, vector<2x32xf32>
    %161 = vector.extract_strided_slice %12 {offsets = [8, 0], sizes = [2, 128], strides = [1, 1]} : vector<16x128xf32> to vector<2x128xf32>
    %cst_30 = arith.constant dense<0.000000e+00> : vector<2x128xf32>
    %162 = tpu.matmul %157, %14, %cst_30 {dimension_numbers = #tpu.dot_dimension_numbers<[1], [0], [0], [1], [0, 0, 1, 1], [], []>} : vector<2x32xf32>, vector<32x128xf32>, vector<2x128xf32> -> vector<2x128xf32>
    %163 = arith.addf %161, %162 : vector<2x128xf32>
    %164 = vector.extract_strided_slice %163 {offsets = [0, 0], sizes = [2, 32], strides = [1, 1]} : vector<2x128xf32> to vector<2x32xf32>
    %165 = arith.negf %164 : vector<2x32xf32>
    %166 = math.exp %165 : vector<2x32xf32>
    %cst_31 = arith.constant 1.000000e+00 : f32
    %167 = vector.broadcast %cst_31 : f32 to vector<2x32xf32>
    %168 = arith.addf %167, %166 : vector<2x32xf32>
    %169 = arith.divf %167, %168 : vector<2x32xf32>
    %170 = vector.extract_strided_slice %163 {offsets = [0, 32], sizes = [2, 32], strides = [1, 1]} : vector<2x128xf32> to vector<2x32xf32>
    %171 = arith.negf %170 : vector<2x32xf32>
    %172 = math.exp %171 : vector<2x32xf32>
    %cst_32 = arith.constant 1.000000e+00 : f32
    %173 = vector.broadcast %cst_32 : f32 to vector<2x32xf32>
    %174 = arith.addf %173, %172 : vector<2x32xf32>
    %175 = arith.divf %173, %174 : vector<2x32xf32>
    %176 = vector.extract_strided_slice %163 {offsets = [0, 64], sizes = [2, 32], strides = [1, 1]} : vector<2x128xf32> to vector<2x32xf32>
    %177 = math.tanh %176 : vector<2x32xf32>
    %178 = vector.extract_strided_slice %163 {offsets = [0, 96], sizes = [2, 32], strides = [1, 1]} : vector<2x128xf32> to vector<2x32xf32>
    %179 = arith.negf %178 : vector<2x32xf32>
    %180 = math.exp %179 : vector<2x32xf32>
    %cst_33 = arith.constant 1.000000e+00 : f32
    %181 = vector.broadcast %cst_33 : f32 to vector<2x32xf32>
    %182 = arith.addf %181, %180 : vector<2x32xf32>
    %183 = arith.divf %181, %182 : vector<2x32xf32>
    %184 = arith.mulf %175, %160 : vector<2x32xf32>
    %185 = arith.mulf %169, %177 : vector<2x32xf32>
    %186 = arith.addf %184, %185 : vector<2x32xf32>
    %187 = math.tanh %186 : vector<2x32xf32>
    %188 = arith.mulf %183, %187 : vector<2x32xf32>
    %c4_i32 = arith.constant 4 : i32
    %189 = vector.broadcast %c4_i32 : i32 to vector<2x1xi32>
    %190 = arith.cmpi sgt, %13, %189 : vector<2x1xi32>
    %191 = vector.shape_cast %190 : vector<2x1xi1> to vector<2x1xi1>
    %192 = vector.broadcast %191 : vector<2x1xi1> to vector<2x32xi1>
    %193 = arith.select %192, %188, %157 : vector<2x32xi1>, vector<2x32xf32>
    %194 = vector.shape_cast %190 : vector<2x1xi1> to vector<2x1xi1>
    %195 = vector.broadcast %194 : vector<2x1xi1> to vector<2x32xi1>
    %196 = arith.select %195, %186, %160 : vector<2x32xi1>, vector<2x32xf32>
    %197 = vector.extract_strided_slice %12 {offsets = [10, 0], sizes = [2, 128], strides = [1, 1]} : vector<16x128xf32> to vector<2x128xf32>
    %cst_34 = arith.constant dense<0.000000e+00> : vector<2x128xf32>
    %198 = tpu.matmul %193, %14, %cst_34 {dimension_numbers = #tpu.dot_dimension_numbers<[1], [0], [0], [1], [0, 0, 1, 1], [], []>} : vector<2x32xf32>, vector<32x128xf32>, vector<2x128xf32> -> vector<2x128xf32>
    %199 = arith.addf %197, %198 : vector<2x128xf32>
    %200 = vector.extract_strided_slice %199 {offsets = [0, 0], sizes = [2, 32], strides = [1, 1]} : vector<2x128xf32> to vector<2x32xf32>
    %201 = arith.negf %200 : vector<2x32xf32>
    %202 = math.exp %201 : vector<2x32xf32>
    %cst_35 = arith.constant 1.000000e+00 : f32
    %203 = vector.broadcast %cst_35 : f32 to vector<2x32xf32>
    %204 = arith.addf %203, %202 : vector<2x32xf32>
    %205 = arith.divf %203, %204 : vector<2x32xf32>
    %206 = vector.extract_strided_slice %199 {offsets = [0, 32], sizes = [2, 32], strides = [1, 1]} : vector<2x128xf32> to vector<2x32xf32>
    %207 = arith.negf %206 : vector<2x32xf32>
    %208 = math.exp %207 : vector<2x32xf32>
    %cst_36 = arith.constant 1.000000e+00 : f32
    %209 = vector.broadcast %cst_36 : f32 to vector<2x32xf32>
    %210 = arith.addf %209, %208 : vector<2x32xf32>
    %211 = arith.divf %209, %210 : vector<2x32xf32>
    %212 = vector.extract_strided_slice %199 {offsets = [0, 64], sizes = [2, 32], strides = [1, 1]} : vector<2x128xf32> to vector<2x32xf32>
    %213 = math.tanh %212 : vector<2x32xf32>
    %214 = vector.extract_strided_slice %199 {offsets = [0, 96], sizes = [2, 32], strides = [1, 1]} : vector<2x128xf32> to vector<2x32xf32>
    %215 = arith.negf %214 : vector<2x32xf32>
    %216 = math.exp %215 : vector<2x32xf32>
    %cst_37 = arith.constant 1.000000e+00 : f32
    %217 = vector.broadcast %cst_37 : f32 to vector<2x32xf32>
    %218 = arith.addf %217, %216 : vector<2x32xf32>
    %219 = arith.divf %217, %218 : vector<2x32xf32>
    %220 = arith.mulf %211, %196 : vector<2x32xf32>
    %221 = arith.mulf %205, %213 : vector<2x32xf32>
    %222 = arith.addf %220, %221 : vector<2x32xf32>
    %223 = math.tanh %222 : vector<2x32xf32>
    %224 = arith.mulf %219, %223 : vector<2x32xf32>
    %c5_i32 = arith.constant 5 : i32
    %225 = vector.broadcast %c5_i32 : i32 to vector<2x1xi32>
    %226 = arith.cmpi sgt, %13, %225 : vector<2x1xi32>
    %227 = vector.shape_cast %226 : vector<2x1xi1> to vector<2x1xi1>
    %228 = vector.broadcast %227 : vector<2x1xi1> to vector<2x32xi1>
    %229 = arith.select %228, %224, %193 : vector<2x32xi1>, vector<2x32xf32>
    %230 = vector.shape_cast %226 : vector<2x1xi1> to vector<2x1xi1>
    %231 = vector.broadcast %230 : vector<2x1xi1> to vector<2x32xi1>
    %232 = arith.select %231, %222, %196 : vector<2x32xi1>, vector<2x32xf32>
    %233 = vector.extract_strided_slice %12 {offsets = [12, 0], sizes = [2, 128], strides = [1, 1]} : vector<16x128xf32> to vector<2x128xf32>
    %cst_38 = arith.constant dense<0.000000e+00> : vector<2x128xf32>
    %234 = tpu.matmul %229, %14, %cst_38 {dimension_numbers = #tpu.dot_dimension_numbers<[1], [0], [0], [1], [0, 0, 1, 1], [], []>} : vector<2x32xf32>, vector<32x128xf32>, vector<2x128xf32> -> vector<2x128xf32>
    %235 = arith.addf %233, %234 : vector<2x128xf32>
    %236 = vector.extract_strided_slice %235 {offsets = [0, 0], sizes = [2, 32], strides = [1, 1]} : vector<2x128xf32> to vector<2x32xf32>
    %237 = arith.negf %236 : vector<2x32xf32>
    %238 = math.exp %237 : vector<2x32xf32>
    %cst_39 = arith.constant 1.000000e+00 : f32
    %239 = vector.broadcast %cst_39 : f32 to vector<2x32xf32>
    %240 = arith.addf %239, %238 : vector<2x32xf32>
    %241 = arith.divf %239, %240 : vector<2x32xf32>
    %242 = vector.extract_strided_slice %235 {offsets = [0, 32], sizes = [2, 32], strides = [1, 1]} : vector<2x128xf32> to vector<2x32xf32>
    %243 = arith.negf %242 : vector<2x32xf32>
    %244 = math.exp %243 : vector<2x32xf32>
    %cst_40 = arith.constant 1.000000e+00 : f32
    %245 = vector.broadcast %cst_40 : f32 to vector<2x32xf32>
    %246 = arith.addf %245, %244 : vector<2x32xf32>
    %247 = arith.divf %245, %246 : vector<2x32xf32>
    %248 = vector.extract_strided_slice %235 {offsets = [0, 64], sizes = [2, 32], strides = [1, 1]} : vector<2x128xf32> to vector<2x32xf32>
    %249 = math.tanh %248 : vector<2x32xf32>
    %250 = vector.extract_strided_slice %235 {offsets = [0, 96], sizes = [2, 32], strides = [1, 1]} : vector<2x128xf32> to vector<2x32xf32>
    %251 = arith.negf %250 : vector<2x32xf32>
    %252 = math.exp %251 : vector<2x32xf32>
    %cst_41 = arith.constant 1.000000e+00 : f32
    %253 = vector.broadcast %cst_41 : f32 to vector<2x32xf32>
    %254 = arith.addf %253, %252 : vector<2x32xf32>
    %255 = arith.divf %253, %254 : vector<2x32xf32>
    %256 = arith.mulf %247, %232 : vector<2x32xf32>
    %257 = arith.mulf %241, %249 : vector<2x32xf32>
    %258 = arith.addf %256, %257 : vector<2x32xf32>
    %259 = math.tanh %258 : vector<2x32xf32>
    %260 = arith.mulf %255, %259 : vector<2x32xf32>
    %c6_i32 = arith.constant 6 : i32
    %261 = vector.broadcast %c6_i32 : i32 to vector<2x1xi32>
    %262 = arith.cmpi sgt, %13, %261 : vector<2x1xi32>
    %263 = vector.shape_cast %262 : vector<2x1xi1> to vector<2x1xi1>
    %264 = vector.broadcast %263 : vector<2x1xi1> to vector<2x32xi1>
    %265 = arith.select %264, %260, %229 : vector<2x32xi1>, vector<2x32xf32>
    %266 = vector.shape_cast %262 : vector<2x1xi1> to vector<2x1xi1>
    %267 = vector.broadcast %266 : vector<2x1xi1> to vector<2x32xi1>
    %268 = arith.select %267, %258, %232 : vector<2x32xi1>, vector<2x32xf32>
    %269 = vector.extract_strided_slice %12 {offsets = [14, 0], sizes = [2, 128], strides = [1, 1]} : vector<16x128xf32> to vector<2x128xf32>
    %cst_42 = arith.constant dense<0.000000e+00> : vector<2x128xf32>
    %270 = tpu.matmul %265, %14, %cst_42 {dimension_numbers = #tpu.dot_dimension_numbers<[1], [0], [0], [1], [0, 0, 1, 1], [], []>} : vector<2x32xf32>, vector<32x128xf32>, vector<2x128xf32> -> vector<2x128xf32>
    %271 = arith.addf %269, %270 : vector<2x128xf32>
    %272 = vector.extract_strided_slice %271 {offsets = [0, 0], sizes = [2, 32], strides = [1, 1]} : vector<2x128xf32> to vector<2x32xf32>
    %273 = arith.negf %272 : vector<2x32xf32>
    %274 = math.exp %273 : vector<2x32xf32>
    %cst_43 = arith.constant 1.000000e+00 : f32
    %275 = vector.broadcast %cst_43 : f32 to vector<2x32xf32>
    %276 = arith.addf %275, %274 : vector<2x32xf32>
    %277 = arith.divf %275, %276 : vector<2x32xf32>
    %278 = vector.extract_strided_slice %271 {offsets = [0, 32], sizes = [2, 32], strides = [1, 1]} : vector<2x128xf32> to vector<2x32xf32>
    %279 = arith.negf %278 : vector<2x32xf32>
    %280 = math.exp %279 : vector<2x32xf32>
    %cst_44 = arith.constant 1.000000e+00 : f32
    %281 = vector.broadcast %cst_44 : f32 to vector<2x32xf32>
    %282 = arith.addf %281, %280 : vector<2x32xf32>
    %283 = arith.divf %281, %282 : vector<2x32xf32>
    %284 = vector.extract_strided_slice %271 {offsets = [0, 64], sizes = [2, 32], strides = [1, 1]} : vector<2x128xf32> to vector<2x32xf32>
    %285 = math.tanh %284 : vector<2x32xf32>
    %286 = vector.extract_strided_slice %271 {offsets = [0, 96], sizes = [2, 32], strides = [1, 1]} : vector<2x128xf32> to vector<2x32xf32>
    %287 = arith.negf %286 : vector<2x32xf32>
    %288 = math.exp %287 : vector<2x32xf32>
    %cst_45 = arith.constant 1.000000e+00 : f32
    %289 = vector.broadcast %cst_45 : f32 to vector<2x32xf32>
    %290 = arith.addf %289, %288 : vector<2x32xf32>
    %291 = arith.divf %289, %290 : vector<2x32xf32>
    %292 = arith.mulf %283, %268 : vector<2x32xf32>
    %293 = arith.mulf %277, %285 : vector<2x32xf32>
    %294 = arith.addf %292, %293 : vector<2x32xf32>
    %295 = math.tanh %294 : vector<2x32xf32>
    %296 = arith.mulf %291, %295 : vector<2x32xf32>
    %c7_i32 = arith.constant 7 : i32
    %297 = vector.broadcast %c7_i32 : i32 to vector<2x1xi32>
    %298 = arith.cmpi sgt, %13, %297 : vector<2x1xi32>
    %299 = vector.shape_cast %298 : vector<2x1xi1> to vector<2x1xi1>
    %300 = vector.broadcast %299 : vector<2x1xi1> to vector<2x32xi1>
    %301 = arith.select %300, %296, %265 : vector<2x32xi1>, vector<2x32xf32>
    %c0_46 = arith.constant 0 : index
    %c0_47 = arith.constant 0 : index
    %302 = vector.load %arg6[%c0_46, %c0_47] : memref<32x64xf32, #tpu.memory_space<vmem>>, vector<32x64xf32>
    %cst_48 = arith.constant dense<0.000000e+00> : vector<2x64xf32>
    %303 = tpu.matmul %301, %302, %cst_48 {dimension_numbers = #tpu.dot_dimension_numbers<[1], [0], [0], [1], [0, 0, 1, 1], [], []>} : vector<2x32xf32>, vector<32x64xf32>, vector<2x64xf32> -> vector<2x64xf32>
    %c0_49 = arith.constant 0 : index
    %c0_50 = arith.constant 0 : index
    %304 = vector.load %arg7[%c0_49, %c0_50] : memref<1x64xf32, #tpu.memory_space<vmem>>, vector<1x64xf32>
    %305 = vector.broadcast %304 : vector<1x64xf32> to vector<2x64xf32>
    %306 = arith.addf %303, %305 : vector<2x64xf32>
    %cst_51 = arith.constant 0.000000e+00 : f32
    %307 = vector.broadcast %cst_51 : f32 to vector<2x64xf32>
    %308 = arith.maximumf %306, %307 : vector<2x64xf32>
    %c0_52 = arith.constant 0 : index
    %c0_53 = arith.constant 0 : index
    %309 = vector.load %arg8[%c0_52, %c0_53] : memref<64x16xf32, #tpu.memory_space<vmem>>, vector<64x16xf32>
    %cst_54 = arith.constant dense<0.000000e+00> : vector<2x16xf32>
    %310 = tpu.matmul %308, %309, %cst_54 {dimension_numbers = #tpu.dot_dimension_numbers<[1], [0], [0], [1], [0, 0, 1, 1], [], []>} : vector<2x64xf32>, vector<64x16xf32>, vector<2x16xf32> -> vector<2x16xf32>
    %c0_55 = arith.constant 0 : index
    %c0_56 = arith.constant 0 : index
    %311 = vector.load %arg9[%c0_55, %c0_56] : memref<1x16xf32, #tpu.memory_space<vmem>>, vector<1x16xf32>
    %312 = vector.broadcast %311 : vector<1x16xf32> to vector<2x16xf32>
    %313 = arith.addf %310, %312 : vector<2x16xf32>
    %c0_57 = arith.constant 0 : index
    %c0_58 = arith.constant 0 : index
    %314 = vector.load %arg10[%c0_57, %c0_58] : memref<2x16xf32, #tpu.memory_space<vmem>>, vector<2x16xf32>
    tpu.vector_store %arg10[%c0_57, %c0_58], %313 {strides = array<i32>} : memref<2x16xf32, #tpu.memory_space<vmem>>, vector<2x16xf32>,
    return
  }
}

</mosaic_0001>

<bundles_post_ra>
// kernel: tpu_custom_call.1
= control target key start
LH: loop header
LB: loop body
LE: loop exit
PB: predicated region body
PF: predicated region fallthrough
CT: control target
= control target key end

     0   :  { %v1885_v3 = vmov 0.0|0.0   ;;  %vm1886_vm0 = vmmov 0   ;;  %v1887_v6 = vmov 0.0   ;;  %v1888_v7 = vmov 0   ;;  %s2238_s0 = inlined_call_operand.vmem [shape: s32[16,1], index: 0, kind: input, shape index: {}]   ;;  %s2239_s1 = inlined_call_operand.vmem [shape: s32[2,1], index: 1, kind: input, shape index: {}]   ;;  %s2240_s2 = inlined_call_operand.vmem [shape: f32[56,32], index: 2, kind: input, shape index: {}]   ;;  %s2241_s3 = inlined_call_operand.vmem [shape: f32[32,128], index: 3, kind: input, shape index: {}]   ;;  %s2242_s4 = inlined_call_operand.vmem [shape: f32[32,128], index: 4, kind: input, shape index: {}]   ;;  %s2243_s5 = inlined_call_operand.vmem [shape: f32[1,128], index: 5, kind: input, shape index: {}]   ;;  %s2244_s6 = inlined_call_operand.vmem [shape: f32[32,64], index: 6, kind: input, shape index: {}]   ;;  %s2245_s7 = inlined_call_operand.vmem [shape: f32[1,64], index: 7, kind: input, shape index: {}]   ;;  %s2246_s8 = inlined_call_operand.vmem [shape: f32[64,16], index: 8, kind: input, shape index: {}]   ;;  %s2247_s9 = inlined_call_operand.vmem [shape: f32[1,16], index: 9, kind: input, shape index: {}]   ;;  %s2248_s10 = inlined_call_operand.hbm [shape: f32[2,16], index: 10, kind: output, shape index: {}]  }
   0x1   :  { %v59_v0 = vld [vmem:[%s2241_s3] sm:$0xff]  ;;  %v60_v1 = vld [vmem:[%s2241_s3 + $0x8] sm:$0xff]  ;;  %v61_v2 = vld [vmem:[%s2241_s3 + $0x10] sm:$0xff]  ;;  %1703 = vmatprep.subr.bf16.mxu0 %v1885_v3  ;;  %1547 = vmatprep.mubr.msk.f32.mxu0 %vm1886_vm0, %v1887_v6 }
   0x2   :  { %v1704_v4 = vpack.c.bf16 %v60_v1, %v59_v0  ;;  %v62_v5 = vld [vmem:[%s2241_s3 + $0x18] sm:$0xff]  ;;  %1795 = vset.pattern.permute.xlu0 %v1888_v7  ;;  %1721 = vmatprep.subr.bf16.mxu1 %v1885_v3  ;;  %v36_v9 = vld [vmem:[%s2238_s0] sm:$0xff] }
   0x3   :  { %v1707_v8 = vpack.c.bf16 %v62_v5, %v61_v2  ;;  %1593 = vmatprep.mubr.msk.f32.mxu1 %vm1886_vm0, %v1887_v6  ;;  %41 = vperm.xlu0 %1795, %v36_v9   ;;  %v1974_v10 = vld [vmem:[%s2239_s1] sm:$0x3] }
   0x4   :  { %1705 = vmatpush3.bf16.msra.mxu0 %v1704_v4 }
   0x5   :  { %1706 = vmatprep.subr.bf16.mxu0 %v1885_v3 }
   0x6   :  { %15 = vsyncpa [#allocation3], 0  ;;  %v37_v11 = vld [vmem:[%s2238_s0 + $0x8] sm:$0xff]  ;;  %1796 = vset.pattern.permute.xlu1 %v1888_v7  ;;  %vm377_vm1 = vcmp.gt.s32.totalorder %v1974_v10, 0  ;;  %v52_v12 = vld [vmem:[%s2240_s2] sm:$0xff]  ;;  %vm63_vm2 = vcmask 261120   ;;  %v38_v26 = vlaneseq }
   0x7   :  { %44 = vperm.xlu0 %1795, %v37_v11   ;;  %v378_v13 = vsel %vm377_vm1, 1, %v1888_v7  ;;  %v53_v14 = vld [vmem:[%s2240_s2 + $0x8] sm:$0xff]  ;;  %v54_v15 = vld [vmem:[%s2240_s2 + $0x10] sm:$0xff]  ;;  %v55_v16 = vld [vmem:[%s2240_s2 + $0x18] sm:$0xff]  ;;  %vm192_vm3 = vcmask 457728   ;;  %s1889_s25 = smov 64  }
   0x8   :  { %1708 = vmatpush3.bf16.msra.mxu0 %v1707_v8  ;;  %v56_v17 = vld [vmem:[%s2240_s2 + $0x20] sm:$0xff]  ;;  %v57_v18 = vld [vmem:[%s2240_s2 + $0x28] sm:$0xff]  ;;  %v58_v19 = vld [vmem:[%s2240_s2 + $0x30] sm:$0xff]  ;;  %v39_v27 = vand.u32 127, %v38_v26  ;;  %vm491_vm7 = vcmp.gt.s32.totalorder %v1974_v10, 1  ;;  %s1891_s26 = smov 96  }
   0x9   :  { %v275_v20 = vld [vmem:[%s2242_s4] sm:$0xff]  ;;  %v276_v21 = vld [vmem:[%s2242_s4 + $0x8] sm:$0xff]  ;;  %v277_v23 = vld [vmem:[%s2242_s4 + $0x10] sm:$0xff]  ;;  %v492_v26 = vsel %vm491_vm7, 1, %v1888_v7  ;;  %vm619_vm9 = vcmp.gt.s32.totalorder %v1974_v10, 2  ;;  %vm743_vm11 = vcmp.gt.s32.totalorder %v1974_v10, 3 }
   0xa   :  { %v2028_v22 = vpack.c.bf16 %v276_v21, %v275_v20  ;;  %v278_v24 = vld [vmem:[%s2242_s4 + $0x18] sm:$0xff]  ;;  %v1443_v51 = vld [vmem:[%s2243_s5] ss:$0 sm:$0xff]  ;;  %s1890_s5 = smov 32   ;;  %vm863_vm13 = vcmp.gt.s32.totalorder %v1974_v10, 4  ;;  %vm980_vm15 = vcmp.gt.s32.totalorder %v1974_v10, 5 }
   0xb   :  { %1548 = vmatmul.mubr.msk.f32.vlgmr.msra.gmra.mrb[0].mxu0 %vm63_vm2, %v52_v12  ;;  %380 = vperm.xlu0 %1795, %v378_v13   ;;  %v2038_v25 = vpack.c.bf16 %v278_v24, %v277_v23  ;;  %s1892_s1 = smov [#allocation2]  }
   0xc   :  { %1550 = vmatprep.mubr.msk.f32.mxu0 %vm1886_vm0, %v1887_v6  ;;  %1723 = vmatpush3.bf16.msra.mxu1 %v2028_v22  ;;  %s1426_s0 = sshll.u32 %s1892_s1, 4  ;;  %s1427_s0 = int_to_ptr.vmem [resolvable:$true] %s1426_s0 }
   0xd   :  { %1724 = vmatprep.subr.bf16.mxu1 %v1885_v3  ;;  %p1866_p1 = scmp.lt.s32.totalorder %s1427_s0, %s1427_s0 }
   0xf   :  { %1551 = vmatmul.mubr.msk.f32.gmra.mrb[2].mxu0 %vm63_vm2, %v53_v14 }
  0x10   :  { %1553 = vmatprep.mubr.msk.f32.mxu0 %vm1886_vm0, %v1887_v6  ;;  %1726 = vmatpush3.bf16.msra.mxu1 %v2038_v25 }
  0x11   :  { %1727 = vmatprep.subr.bf16.mxu1 %v1885_v3 }
  0x13   :  { %1554 = vmatmul.mubr.msk.f32.gmra.mrb[4].mxu0 %vm63_vm2, %v54_v15  ;;  %1594 = vmatmul.mubr.f32.vlgmr.msra.gmra.mrb[0].mxu1 %v1887_v6 }
  0x14   :  { %1556 = vmatprep.mubr.msk.f32.mxu0 %vm1886_vm0, %v1887_v6  ;;  %1729 = vmatpush3.bf16.msra.mxu1 %v2028_v22 }
  0x15   :  { %1604 = vmatprep.mubr.msk.f32.mxu1 %vm1886_vm0, %v1887_v6  ;;  %1730 = vmatprep.subr.bf16.mxu1 %v1885_v3 }
  0x17   :  { %1557 = vmatmul.mubr.msk.f32.gmra.mrb[6].mxu0 %vm63_vm2, %v55_v16 }
  0x18   :  { %1559 = vmatprep.mubr.msk.f32.mxu0 %vm1886_vm0, %v1887_v6  ;;  %1732 = vmatpush3.bf16.msra.mxu1 %v2038_v25 }
  0x19   :  { %1733 = vmatprep.subr.bf16.mxu1 %v1885_v3 }
  0x1b   :  { %1560 = vmatmul.mubr.msk.f32.gmra.mrb[8].mxu0 %vm63_vm2, %v56_v17 }
  0x1c   :  { %1562 = vmatprep.mubr.msk.f32.mxu0 %vm1886_vm0, %v1887_v6 }
  0x1f   :  { %1563 = vmatmul.mubr.msk.f32.gmra.mrb[10].mxu0 %vm63_vm2, %v57_v18 }
  0x20   :  { %1565 = vmatprep.mubr.msk.f32.mxu0 %vm1886_vm0, %v1887_v6 }
  0x23   :  { %1566 = vmatmul.mubr.msk.f32.gmra.mrb[12].mxu0 %vm63_vm2, %v58_v19 }
  0x82   :  { %v42_v28 = vpop.permute.xlu0 %41 }
  0x83   :  { %vm46_vm4 = vcmp.eq.s32.totalorder %v42_v28, %v39_v27 }
  0x84   :  { %v1434_v29 = vsel %vm46_vm4, 1.0, %v1887_v6 }
  0x85   :  { %1582 = vmatprep.mubr.msk.f32.mxu0 %vm192_vm3, %v1434_v29 }
  0x86   :  { %v45_v46 = vpop.permute.xlu0 %44 }
  0x87   :  { %vm47_vm5 = vcmp.eq.s32.totalorder %v45_v46, %v39_v27 }
  0x88   :  { %v1435_v48 = vsel %vm47_vm5, 1.0, %v1887_v6  ;;  %vm1232_vm5 = vcmp.gt.s32.totalorder %v1974_v10, 7 }
  0x8a   :  { %v381_v5 = vpop.permute.xlu0 %380 }
  0x8b   :  { %vm382_vm6 = vcmp.eq.s32.totalorder %v381_v5, 1 }
  0xde   :  { %v151_v30 = vpop.f32.mrb[0].mxu0 }
  0xdf   :  { %v1549_v31 = vpop.f32.mrb[1].mxu0 }
  0xe2   :  { %v156_v32 = vpop.f32.mrb[2].mxu0 }
  0xe3   :  { %v1709_v33 = vpack.c.bf16 %v156_v32, %v151_v30  ;;  %v1552_v34 = vpop.f32.mrb[3].mxu0 }
  0xe5   :  { %1710 = vmatprep.subr.bf16.mxu0 %v1709_v33 }
  0xe6   :  { %v161_v35 = vpop.f32.mrb[4].mxu0  ;;  %1712 = vmatpush3.bf16.msra.mxu0 %v1709_v33  ;;  %v348_v49 = vpop.f32.mrb[0].mxu1 }
  0xe7   :  { %v1555_v36 = vpop.f32.mrb[5].mxu0  ;;  %v1595_v50 = vpop.f32.mrb[1].mxu1 }
  0xea   :  { %v166_v37 = vpop.f32.mrb[6].mxu0 }
  0xeb   :  { %v1713_v38 = vpack.c.bf16 %v166_v37, %v161_v35  ;;  %v1558_v39 = vpop.f32.mrb[7].mxu0 }
  0xed   :  { %1714 = vmatprep.subr.bf16.mxu0 %v1713_v38 }
  0xee   :  { %v171_v40 = vpop.f32.mrb[8].mxu0  ;;  %1716 = vmatpush3.bf16.msra.mxu0 %v1713_v38 }
  0xef   :  { %v1561_v41 = vpop.f32.mrb[9].mxu0 }
  0xf2   :  { %v176_v42 = vpop.f32.mrb[10].mxu0 }
  0xf3   :  { %v1717_v43 = vpack.c.bf16 %v176_v42, %v171_v40  ;;  %v1564_v44 = vpop.f32.mrb[11].mxu0 }
  0xf5   :  { %1718 = vmatprep.subr.bf16.mxu0 %v1717_v43 }
  0xf6   :  { %1720 = vmatpush3.bf16.msra.mxu0 %v1717_v43  ;;  %v181_v45 = vpop.f32.mrb[12].mxu0 }
  0xf7   :  { %1580 = vmatprep.subr.mxu0 %v181_v45  ;;  %v1567_v47 = vpop.f32.mrb[13].mxu0 }
  0xfa   :  { %1581 = vmatpush3.msra.mxu0 %v181_v45 }
  0xfb   :  { %1583 = vmatmul.mubr.msk.f32.vlgmr.msra.gmra.mrb[14].mxu0 %vm192_vm3, %v1435_v48  ;;  %1745 = vmatprep.subr.bf16.mxu0 %v1885_v3  ;;  %vm1108_vm3 = vcmp.gt.s32.totalorder %v1974_v10, 6  ;;  %v1246_v10 = vld [vmem:[%s2244_s6 + $0x10] sm:$0xff] }
  0xfc   :  { %1747 = vmatpush3.bf16.msra.mxu0 %v2028_v22  ;;  %1637 = vmatprep.mubr.msk.f32.mxu0 %vm1886_vm0, %v1887_v6 }
  0xfd   :  { %1748 = vmatprep.subr.bf16.mxu0 %v1885_v3 }
 0x100   :  { %1750 = vmatpush3.bf16.msra.mxu0 %v2038_v25 }
 0x101   :  { %1757 = vmatprep.subr.bf16.mxu0 %v1885_v3 }
 0x1ce   :  { %v1584_v52 = vpop.f32.mrb[14].mxu0 }
 0x1cf   :  { %v2063_v53 = vadd.f32 %v1584_v52, %v1443_v51  ;;  %v265_v54 = vpop.f32.mrb[15].mxu0 }
 0x1d0   :  { %v2065_v55 = vadd.f32 %v1443_v51, %v265_v54 }
 0x1d2   :  { %v352_v56 = vadd.f32 %v348_v49, %v2065_v55 }
 0x1d4   :  { %1797 = vtanh.f32 %v352_v56  ;;  %v1446_v58 = vmul.f32 -1.442695, %v352_v56 }
 0x1d6   :  { %1799 = vpow2.f32 %v1446_v58 }
 0x1de   :  { %v1798_v57 = vpop.eup %1797 }
 0x1df   :  { %362 = vrot.lane.b32.xlu1 %v1798_v57, %s1889_s25  ;;  %v620_v57 = vsel %vm619_vm9, 1, %v1888_v7 }
 0x1e0   :  { %v1800_v59 = vpop.eup %1799 }
 0x1e1   :  { %v356_v60 = vadd.f32 1.0, %v1800_v59 }
 0x1e3   :  { %1801 = vrcp.f32 %v356_v60 }
 0x1ed   :  { %v1802_v61 = vpop.eup %1801 }
 0x1ee   :  { %v360_v0 = vmul.f32 0.0, %v1802_v61 }
 0x251   :  { %v363_v62 = vpop.permute.xlu1 %362 }
 0x252   :  { %v365_v63 = vmul.f32 %v1802_v61, %v363_v62 }
 0x254   :  { %367 = vrot.lane.b32.xlu1 %v365_v63, %s1890_s5 }
 0x2c6   :  { %v368_v1 = vpop.permute.xlu1 %367 }
 0x2c7   :  { %v370_v2 = vadd.f32 %v368_v1, %v360_v0 }
 0x2c9   :  { %1803 = vtanh.f32 %v370_v2  ;;  %v384_v27 = vsel %vm382_vm6, %v370_v2, 0.0 }
 0x2ca   :  { %v472_v28 = vrot.slane %v384_v27, 6 }
 0x2d3   :  { %v1804_v4 = vpop.eup %1803 }
 0x2d4   :  { %373 = vrot.lane.b32.xlu1 %v1804_v4, %s1889_s25 }
 0x346   :  { %v374_v8 = vpop.permute.xlu1 %373 }
 0x347   :  { %v376_v9 = vmul.f32 %v1802_v61, %v374_v8 }
 0x349   :  { %v383_v11 = vsel %vm382_vm6, %v376_v9, 0.0  ;;  %vm1344_vm6 = vcmask 523264  }
 0x34a   :  { %386 = vrot.lane.b32.xlu0 %v383_v11, %s1890_s5 }
 0x3bc   :  { %v387_v12 = vpop.permute.xlu0 %386 }
 0x3bd   :  { %1605 = vmatmul.mubr.msk.f32.vlgmr.msra.gmra.mrb[2].mxu1 %vm63_vm2, %v387_v12 }
 0x3be   :  { %1735 = vmatpush3.bf16.msra.mxu1 %v2028_v22  ;;  %1615 = vmatprep.mubr.msk.f32.mxu1 %vm1886_vm0, %v1887_v6 }
 0x3bf   :  { %1736 = vmatprep.subr.bf16.mxu1 %v1885_v3 }
 0x3c2   :  { %1738 = vmatpush3.bf16.msra.mxu1 %v2038_v25 }
 0x3c3   :  { %1739 = vmatprep.subr.bf16.mxu1 %v1885_v3 }
 0x490   :  { %v456_v13 = vpop.f32.mrb[2].mxu1 }
 0x491   :  { %v461_v14 = vrot.slane %v456_v13, 6  ;;  %v1606_v15 = vpop.f32.mrb[3].mxu1 }
 0x493   :  { %v463_v16 = vadd.f32 %v461_v14, %v2065_v55 }
 0x495   :  { %1805 = vtanh.f32 %v463_v16  ;;  %v1448_v18 = vmul.f32 -1.442695, %v463_v16 }
 0x497   :  { %1807 = vpow2.f32 %v1448_v18 }
 0x49f   :  { %v1806_v17 = vpop.eup %1805 }
 0x4a0   :  { %476 = vrot.lane.b32.xlu1 %v1806_v17, %s1889_s25 }
 0x4a1   :  { %v1808_v19 = vpop.eup %1807 }
 0x4a2   :  { %v467_v20 = vadd.f32 1.0, %v1808_v19 }
 0x4a4   :  { %1809 = vrcp.f32 %v467_v20 }
 0x4ae   :  { %v1810_v21 = vpop.eup %1809 }
 0x4af   :  { %v474_v29 = vmul.f32 %v1810_v21, %v472_v28 }
 0x512   :  { %v477_v23 = vpop.permute.xlu1 %476 }
 0x513   :  { %v479_v24 = vmul.f32 %v1810_v21, %v477_v23 }
 0x515   :  { %481 = vrot.lane.b32.xlu0 %v479_v24, %s1890_s5 }
 0x519   :  { %494 = vperm.xlu0 %1795, %v492_v26   ;;  %v744_v26 = vsel %vm743_vm11, 1, %v1888_v7 }
 0x587   :  { %v482_v30 = vpop.permute.xlu0 %481 }
 0x588   :  { %v484_v31 = vadd.f32 %v482_v30, %v474_v29 }
 0x58a   :  { %1811 = vtanh.f32 %v484_v31  ;;  %v505_v32 = vrot.slane %v484_v31, 2 }
 0x58c   :  { %506 = vrot.lane.b32.xlu0 %v505_v32, %s1891_s26 }
 0x594   :  { %v1812_v33 = vpop.eup %1811 }
 0x595   :  { %487 = vrot.lane.b32.xlu1 %v1812_v33, %s1889_s25 }
 0x598   :  { %v495_v37 = vpop.permute.xlu0 %494 }
 0x599   :  { %vm496_vm8 = vcmp.eq.s32.totalorder %v495_v37, 1 }
 0x5fe   :  { %v507_v40 = vpop.permute.xlu0 %506 }
 0x607   :  { %v488_v34 = vpop.permute.xlu1 %487 }
 0x608   :  { %v490_v35 = vmul.f32 %v1810_v21, %v488_v34 }
 0x60a   :  { %v498_v36 = vrot.slane %v490_v35, 2  ;;  %v864_v35 = vsel %vm863_vm13, 1, %v1888_v7 }
 0x60c   :  { %499 = vrot.lane.b32.xlu1 %v498_v36, %s1890_s5 }
 0x610   :  { %509 = vrot.lane.b32.xlu1 %v384_v27, %s1891_s26 }
 0x67e   :  { %v500_v38 = vpop.permute.xlu1 %499 }
 0x67f   :  { %v503_v39 = vsel %vm496_vm8, %v500_v38, %v387_v12 }
 0x680   :  { %1616 = vmatmul.mubr.msk.f32.vlgmr.msra.gmra.mrb[4].mxu1 %vm63_vm2, %v503_v39 }
 0x681   :  { %1741 = vmatpush3.bf16.msra.mxu1 %v2028_v22  ;;  %1626 = vmatprep.mubr.msk.f32.mxu1 %vm1886_vm0, %v1887_v6 }
 0x682   :  { %v510_v41 = vpop.permute.xlu1 %509  ;;  %1742 = vmatprep.subr.bf16.mxu1 %v1885_v3 }
 0x683   :  { %v512_v42 = vsel %vm496_vm8, %v507_v40, %v510_v41 }
 0x684   :  { %v598_v43 = vrot.slane %v512_v42, 4 }
 0x685   :  { %1744 = vmatpush3.bf16.msra.mxu1 %v2038_v25 }
 0x686   :  { %599 = vrot.lane.b32.xlu1 %v598_v43, %s1890_s5  ;;  %1751 = vmatprep.subr.bf16.mxu1 %v1885_v3 }
 0x6f8   :  { %v600_v58 = vpop.permute.xlu1 %599 }
 0x753   :  { %v582_v44 = vpop.f32.mrb[4].mxu1 }
 0x754   :  { %v587_v45 = vrot.slane %v582_v44, 4  ;;  %v1617_v46 = vpop.f32.mrb[5].mxu1 }
 0x756   :  { %v589_v47 = vadd.f32 %v587_v45, %v2065_v55 }
 0x758   :  { %1813 = vtanh.f32 %v589_v47  ;;  %v1450_v49 = vmul.f32 -1.442695, %v589_v47 }
 0x75a   :  { %1815 = vpow2.f32 %v1450_v49 }
 0x762   :  { %v1814_v48 = vpop.eup %1813 }
 0x763   :  { %604 = vrot.lane.b32.xlu0 %v1814_v48, %s1889_s25 }
 0x764   :  { %v1816_v50 = vpop.eup %1815 }
 0x765   :  { %v593_v51 = vadd.f32 1.0, %v1816_v50 }
 0x767   :  { %1817 = vrcp.f32 %v593_v51 }
 0x771   :  { %v1818_v52 = vpop.eup %1817 }
 0x772   :  { %v602_v59 = vmul.f32 %v1818_v52, %v600_v58 }
 0x7d5   :  { %v605_v54 = vpop.permute.xlu0 %604 }
 0x7d6   :  { %v607_v56 = vmul.f32 %v1818_v52, %v605_v54 }
 0x7d8   :  { %609 = vrot.lane.b32.xlu0 %v607_v56, %s1890_s5 }
 0x7dc   :  { %622 = vperm.xlu0 %1795, %v620_v57  }
 0x84a   :  { %v610_v60 = vpop.permute.xlu0 %609 }
 0x84b   :  { %v612_v61 = vadd.f32 %v610_v60, %v602_v59 }
 0x84d   :  { %1819 = vtanh.f32 %v612_v61  ;;  %v632_v62 = vrot.slane %v612_v61, 4 }
 0x84f   :  { %633 = vrot.lane.b32.xlu0 %v632_v62, %s1891_s26 }
 0x857   :  { %v1820_v63 = vpop.eup %1819 }
 0x858   :  { %615 = vrot.lane.b32.xlu1 %v1820_v63, %s1889_s25 }
 0x85b   :  { %v623_v0 = vpop.permute.xlu0 %622 }
 0x85c   :  { %vm624_vm10 = vcmp.eq.s32.totalorder %v623_v0, 1 }
 0x8c1   :  { %v634_v1 = vpop.permute.xlu0 %633 }
 0x8c2   :  { %v636_v2 = vsel %vm624_vm10, %v634_v1, %v512_v42 }
 0x8c3   :  { %v722_v4 = vrot.slane %v636_v2, 2 }
 0x8c5   :  { %723 = vrot.lane.b32.xlu0 %v722_v4, %s1890_s5 }
 0x8ca   :  { %v616_v5 = vpop.permute.xlu1 %615 }
 0x8cb   :  { %v618_v8 = vmul.f32 %v1818_v52, %v616_v5 }
 0x8cd   :  { %v626_v9 = vrot.slane %v618_v8, 4 }
 0x8cf   :  { %627 = vrot.lane.b32.xlu1 %v626_v9, %s1890_s5 }
 0x941   :  { %v628_v11 = vpop.permute.xlu1 %627 }
 0x942   :  { %v630_v12 = vsel %vm624_vm10, %v628_v11, %v503_v39 }
 0x943   :  { %1627 = vmatmul.mubr.msk.f32.vlgmr.msra.gmra.mrb[6].mxu1 %vm63_vm2, %v630_v12 }
 0x944   :  { %1753 = vmatpush3.bf16.msra.mxu1 %v2028_v22  ;;  %1648 = vmatprep.mubr.msk.f32.mxu1 %vm1886_vm0, %v1887_v6 }
 0x945   :  { %1754 = vmatprep.subr.bf16.mxu1 %v1885_v3 }
 0x948   :  { %1756 = vmatpush3.bf16.msra.mxu1 %v2038_v25 }
 0x949   :  { %1763 = vmatprep.subr.bf16.mxu1 %v1885_v3 }
 0xa16   :  { %v706_v13 = vpop.f32.mrb[6].mxu1 }
 0xa17   :  { %v711_v14 = vrot.slane %v706_v13, 2  ;;  %v1628_v15 = vpop.f32.mrb[7].mxu1 }
 0xa19   :  { %v713_v16 = vadd.f32 %v711_v14, %v2065_v55  ;;  %v724_v55 = vpop.permute.xlu0 %723 }
 0xa1b   :  { %1821 = vtanh.f32 %v713_v16  ;;  %v1452_v18 = vmul.f32 -1.442695, %v713_v16 }
 0xa1d   :  { %1823 = vpow2.f32 %v1452_v18 }
 0xa25   :  { %v1822_v17 = vpop.eup %1821 }
 0xa26   :  { %728 = vrot.lane.b32.xlu1 %v1822_v17, %s1889_s25 }
 0xa27   :  { %v1824_v19 = vpop.eup %1823 }
 0xa28   :  { %v717_v20 = vadd.f32 1.0, %v1824_v19 }
 0xa2a   :  { %1825 = vrcp.f32 %v717_v20 }
 0xa34   :  { %v1826_v21 = vpop.eup %1825 }
 0xa35   :  { %v726_v27 = vmul.f32 %v1826_v21, %v724_v55 }
 0xa98   :  { %v729_v23 = vpop.permute.xlu1 %728 }
 0xa99   :  { %v731_v24 = vmul.f32 %v1826_v21, %v729_v23 }
 0xa9b   :  { %733 = vrot.lane.b32.xlu1 %v731_v24, %s1890_s5 }
 0xa9f   :  { %746 = vperm.xlu1 %1796, %v744_v26  }
 0xb0d   :  { %v734_v28 = vpop.permute.xlu1 %733 }
 0xb0e   :  { %v736_v29 = vadd.f32 %v734_v28, %v726_v27 }
 0xb10   :  { %1827 = vtanh.f32 %v736_v29  ;;  %v756_v30 = vrot.slane %v736_v29, 6 }
 0xb12   :  { %757 = vrot.lane.b32.xlu1 %v756_v30, %s1891_s26 }
 0xb1a   :  { %v1828_v31 = vpop.eup %1827 }
 0xb1b   :  { %739 = vrot.lane.b32.xlu0 %v1828_v31, %s1889_s25 }
 0xb1e   :  { %v747_v32 = vpop.permute.xlu1 %746 }
 0xb1f   :  { %vm748_vm12 = vcmp.eq.s32.totalorder %v747_v32, 1 }
 0xb84   :  { %v758_v33 = vpop.permute.xlu1 %757 }
 0xb85   :  { %v760_v34 = vsel %vm748_vm12, %v758_v33, %v636_v2 }
 0xb86   :  { %843 = vrot.lane.b32.xlu1 %v760_v34, %s1890_s5 }
 0xb8a   :  { %866 = vperm.xlu1 %1796, %v864_v35  }
 0xb8d   :  { %v740_v36 = vpop.permute.xlu0 %739 }
 0xb8e   :  { %v742_v37 = vmul.f32 %v1826_v21, %v740_v36 }
 0xb90   :  { %v750_v38 = vrot.slane %v742_v37, 6 }
 0xb92   :  { %751 = vrot.lane.b32.xlu0 %v750_v38, %s1890_s5 }
 0xbf8   :  { %v844_v51 = vpop.permute.xlu1 %843 }
 0xc04   :  { %v752_v39 = vpop.permute.xlu0 %751 }
 0xc05   :  { %v754_v40 = vsel %vm748_vm12, %v752_v39, %v630_v12 }
 0xc06   :  { %869 = vrot.lane.b32.xlu1 %v754_v40, %s1891_s26  ;;  %1638 = vmatmul.mubr.msk.f32.vlgmr.msra.gmra.mrb[16].mxu0 %vm63_vm2, %v754_v40 }
 0xc07   :  { %1759 = vmatpush3.bf16.msra.mxu0 %v2028_v22  ;;  %1659 = vmatprep.mubr.msk.f32.mxu0 %vm1886_vm0, %v1887_v6 }
 0xc08   :  { %1760 = vmatprep.subr.bf16.mxu0 %v1885_v3 }
 0xc09   :  { %v867_v58 = vpop.permute.xlu1 %866 }
 0xc0a   :  { %vm868_vm14 = vcmp.eq.s32.totalorder %v867_v58, 1 }
 0xc0b   :  { %1762 = vmatpush3.bf16.msra.mxu0 %v2038_v25 }
 0xc0c   :  { %1769 = vmatprep.subr.bf16.mxu0 %v1885_v3 }
 0xc78   :  { %v870_v61 = vpop.permute.xlu1 %869 }
 0xcd9   :  { %v830_v41 = vpop.f32.mrb[16].mxu0 }
 0xcda   :  { %v834_v42 = vadd.f32 %v830_v41, %v2063_v53  ;;  %v1639_v43 = vpop.f32.mrb[17].mxu0 }
 0xcdb   :  { %v1109_v43 = vsel %vm1108_vm3, 1, %v1888_v7 }
 0xcdc   :  { %1829 = vtanh.f32 %v834_v42  ;;  %v1454_v45 = vmul.f32 -1.442695, %v834_v42 }
 0xcde   :  { %1831 = vpow2.f32 %v1454_v45 }
 0xce6   :  { %v1830_v44 = vpop.eup %1829 }
 0xce7   :  { %848 = vrot.lane.b32.xlu0 %v1830_v44, %s1889_s25 }
 0xce8   :  { %v1832_v46 = vpop.eup %1831 }
 0xce9   :  { %v838_v47 = vadd.f32 1.0, %v1832_v46 }
 0xceb   :  { %1833 = vrcp.f32 %v838_v47 }
 0xcf5   :  { %v1834_v48 = vpop.eup %1833 }
 0xcf6   :  { %v846_v52 = vmul.f32 %v1834_v48, %v844_v51 }
 0xd59   :  { %v849_v49 = vpop.permute.xlu0 %848 }
 0xd5a   :  { %v851_v50 = vmul.f32 %v1834_v48, %v849_v49 }
 0xd5c   :  { %853 = vrot.lane.b32.xlu0 %v851_v50, %s1890_s5 }
 0xdce   :  { %v854_v54 = vpop.permute.xlu0 %853 }
 0xdcf   :  { %v856_v56 = vadd.f32 %v854_v54, %v846_v52 }
 0xdd1   :  { %1835 = vtanh.f32 %v856_v56  ;;  %v873_v14 = vsel %vm868_vm14, %v856_v56, %v844_v51 }
 0xdd2   :  { %v961_v15 = vrot.slane %v873_v14, 6 }
 0xddb   :  { %v1836_v57 = vpop.eup %1835 }
 0xddc   :  { %859 = vrot.lane.b32.xlu0 %v1836_v57, %s1889_s25 }
 0xe4e   :  { %v860_v59 = vpop.permute.xlu0 %859 }
 0xe4f   :  { %v862_v60 = vmul.f32 %v1834_v48, %v860_v59 }
 0xe51   :  { %v872_v62 = vsel %vm868_vm14, %v862_v60, %v870_v61 }
 0xe52   :  { %875 = vrot.lane.b32.xlu0 %v872_v62, %s1890_s5 }
 0xec4   :  { %v876_v63 = vpop.permute.xlu0 %875 }
 0xec5   :  { %1649 = vmatmul.mubr.msk.f32.vlgmr.msra.gmra.mrb[8].mxu1 %vm63_vm2, %v876_v63 }
 0xec6   :  { %1765 = vmatpush3.bf16.msra.mxu1 %v2028_v22  ;;  %1670 = vmatprep.mubr.msk.f32.mxu1 %vm1886_vm0, %v1887_v6 }
 0xec7   :  { %1766 = vmatprep.subr.bf16.mxu1 %v1885_v3 }
 0xeca   :  { %1768 = vmatpush3.bf16.msra.mxu1 %v2038_v25  ;;  %v981_v25 = vsel %vm980_vm15, 1, %v1888_v7 }
 0xecb   :  { %1775 = vmatprep.subr.bf16.mxu1 %v1885_v3 }
 0xf98   :  { %v945_v0 = vpop.f32.mrb[8].mxu1 }
 0xf99   :  { %v950_v1 = vrot.slane %v945_v0, 6  ;;  %v1650_v2 = vpop.f32.mrb[9].mxu1 }
 0xf9b   :  { %v952_v4 = vadd.f32 %v950_v1, %v2063_v53 }
 0xf9d   :  { %1837 = vtanh.f32 %v952_v4  ;;  %v1456_v8 = vmul.f32 -1.442695, %v952_v4 }
 0xf9f   :  { %1839 = vpow2.f32 %v1456_v8 }
 0xfa7   :  { %v1838_v5 = vpop.eup %1837 }
 0xfa8   :  { %965 = vrot.lane.b32.xlu1 %v1838_v5, %s1889_s25 }
 0xfa9   :  { %v1840_v22 = vpop.eup %1839 }
 0xfaa   :  { %v956_v9 = vadd.f32 1.0, %v1840_v22 }
 0xfac   :  { %1841 = vrcp.f32 %v956_v9 }
 0xfb6   :  { %v1842_v11 = vpop.eup %1841 }
 0xfb7   :  { %v963_v16 = vmul.f32 %v1842_v11, %v961_v15 }
0x101a   :  { %v966_v12 = vpop.permute.xlu1 %965 }
0x101b   :  { %v968_v13 = vmul.f32 %v1842_v11, %v966_v12 }
0x101d   :  { %970 = vrot.lane.b32.xlu0 %v968_v13, %s1890_s5 }
0x1021   :  { %983 = vperm.xlu0 %1795, %v981_v25   ;;  %v1244_v25 = vld [vmem:[%s2244_s6] sm:$0xff] }
0x108f   :  { %v971_v17 = vpop.permute.xlu0 %970 }
0x1090   :  { %v973_v18 = vadd.f32 %v971_v17, %v963_v16 }
0x1092   :  { %1843 = vtanh.f32 %v973_v18  ;;  %v994_v19 = vrot.slane %v973_v18, 2  ;;  %v1329_v18 = vld [vmem:[%s2246_s8] sm:$0xff] }
0x1094   :  { %995 = vrot.lane.b32.xlu0 %v994_v19, %s1891_s26  ;;  %v1330_v19 = vld [vmem:[%s2246_s8 + $0x8] sm:$0xff] }
0x109c   :  { %v1844_v20 = vpop.eup %1843 }
0x109d   :  { %976 = vrot.lane.b32.xlu1 %v1844_v20, %s1889_s25  ;;  %v1331_v20 = vld [vmem:[%s2246_s8 + $0x10] sm:$0xff] }
0x10a0   :  { %v984_v26 = vpop.permute.xlu0 %983 }
0x10a1   :  { %vm985_vm1 = vcmp.eq.s32.totalorder %v984_v26, 1  ;;  %v1333_v26 = vld [vmem:[%s2246_s8 + $0x20] sm:$0xff] }
0x1106   :  { %v996_v28 = vpop.permute.xlu0 %995 }
0x110f   :  { %v977_v21 = vpop.permute.xlu1 %976 }
0x1110   :  { %v979_v23 = vmul.f32 %v1842_v11, %v977_v21  ;;  %v1776_v21 = vpack.c.bf16 %v1330_v19, %v1329_v18 }
0x1112   :  { %v987_v24 = vrot.slane %v979_v23, 2  ;;  %v1332_v23 = vld [vmem:[%s2246_s8 + $0x18] sm:$0xff] }
0x1114   :  { %988 = vrot.lane.b32.xlu1 %v987_v24, %s1890_s5  ;;  %v1779_v24 = vpack.c.bf16 %v1332_v23, %v1331_v20 }
0x1118   :  { %998 = vrot.lane.b32.xlu1 %v873_v14, %s1891_s26  ;;  %v1245_v14 = vld [vmem:[%s2244_s6 + $0x8] sm:$0xff] }
0x1119   :  { %v1770_v15 = vpack.c.bf16 %v1245_v14, %v1244_v25 }
0x1186   :  { %v989_v55 = vpop.permute.xlu1 %988 }
0x1187   :  { %v992_v27 = vsel %vm985_vm1, %v989_v55, %v876_v63  ;;  %v1334_v55 = vld [vmem:[%s2246_s8 + $0x28] sm:$0xff] }
0x1188   :  { %1660 = vmatmul.mubr.msk.f32.vlgmr.msra.gmra.mrb[18].mxu0 %vm63_vm2, %v992_v27 }
0x1189   :  { %1681 = vmatprep.mubr.msk.f32.mxu0 %vm1886_vm0, %v1887_v6  ;;  %1771 = vmatpush3.bf16.msra.mxu0 %v1770_v15 }
0x118a   :  { %v999_v29 = vpop.permute.xlu1 %998  ;;  %1772 = vmatprep.subr.bf16.mxu0 %v1885_v3 }
0x118b   :  { %v1001_v30 = vsel %vm985_vm1, %v996_v28, %v999_v29  ;;  %v1782_v28 = vpack.c.bf16 %v1334_v55, %v1333_v26 }
0x118c   :  { %v1087_v31 = vrot.slane %v1001_v30, 4 }
0x118e   :  { %1088 = vrot.lane.b32.xlu1 %v1087_v31, %s1890_s5 }
0x1200   :  { %v1089_v44 = vpop.permute.xlu1 %1088 }
0x125b   :  { %v1071_v32 = vpop.f32.mrb[18].mxu0 }
0x125c   :  { %v1076_v33 = vrot.slane %v1071_v32, 4  ;;  %v1661_v34 = vpop.f32.mrb[19].mxu0 }
0x125d   :  { %v1335_v34 = vld [vmem:[%s2246_s8 + $0x30] sm:$0xff] }
0x125e   :  { %v1078_v35 = vadd.f32 %v1076_v33, %v2063_v53 }
0x1260   :  { %1845 = vtanh.f32 %v1078_v35  ;;  %v1458_v37 = vmul.f32 -1.442695, %v1078_v35  ;;  %v1336_v35 = vld [vmem:[%s2246_s8 + $0x38] sm:$0xff]  ;;  %s1861_s8 = scalar_lea.vmem %s1427_s0, 32 }
0x1261   :  { %p1862_p0 = scmp.ne.s32.totalorder %s1427_s0, %s1861_s8  ;;  %p1867_p2 = scmp.lt.s32.totalorder %s1861_s8, %s1861_s8 }
0x1262   :  { %1847 = vpow2.f32 %v1458_v37 }
0x1263   :  { %p1868_p3 = por %p1867_p2, %p1866_p1 }
0x1265   :  { %p1869_p4 = pnand %p1868_p3, %p1862_p0 }
0x126a   :  { %v1846_v36 = vpop.eup %1845 }
0x126b   :  { %1093 = vrot.lane.b32.xlu0 %v1846_v36, %s1889_s25  ;;  %v1785_v36 = vpack.c.bf16 %v1336_v35, %v1335_v34 }
0x126c   :  { %v1848_v38 = vpop.eup %1847 }
0x126d   :  { %v1082_v39 = vadd.f32 1.0, %v1848_v38 }
0x126f   :  { %1849 = vrcp.f32 %v1082_v39 }
0x1279   :  { %v1850_v40 = vpop.eup %1849 }
0x127a   :  { %v1091_v45 = vmul.f32 %v1850_v40, %v1089_v44 }
0x12dd   :  { %v1094_v41 = vpop.permute.xlu0 %1093 }
0x12de   :  { %v1096_v42 = vmul.f32 %v1850_v40, %v1094_v41  ;;  %v1463_v41 = vld [vmem:[%s2247_s9] ss:$0 sm:$0xff] }
0x12e0   :  { %1098 = vrot.lane.b32.xlu0 %v1096_v42, %s1890_s5 }
0x12e4   :  { %1111 = vperm.xlu0 %1795, %v1109_v43  }
0x1352   :  { %v1099_v46 = vpop.permute.xlu0 %1098 }
0x1353   :  { %v1101_v47 = vadd.f32 %v1099_v46, %v1091_v45 }
0x1355   :  { %1851 = vtanh.f32 %v1101_v47  ;;  %v1121_v48 = vrot.slane %v1101_v47, 4 }
0x1357   :  { %1122 = vrot.lane.b32.xlu0 %v1121_v48, %s1891_s26 }
0x135f   :  { %v1852_v49 = vpop.eup %1851 }
0x1360   :  { %1104 = vrot.lane.b32.xlu1 %v1852_v49, %s1889_s25 }
0x1363   :  { %v1112_v50 = vpop.permute.xlu0 %1111 }
0x1364   :  { %vm1113_vm4 = vcmp.eq.s32.totalorder %v1112_v50, 1 }
0x13c9   :  { %v1123_v51 = vpop.permute.xlu0 %1122 }
0x13ca   :  { %v1125_v52 = vsel %vm1113_vm4, %v1123_v51, %v1001_v30 }
0x13cb   :  { %v1211_v54 = vrot.slane %v1125_v52, 2 }
0x13cd   :  { %1212 = vrot.lane.b32.xlu0 %v1211_v54, %s1890_s5 }
0x13d2   :  { %v1105_v56 = vpop.permute.xlu1 %1104 }
0x13d3   :  { %v1107_v57 = vmul.f32 %v1850_v40, %v1105_v56 }
0x13d5   :  { %v1115_v58 = vrot.slane %v1107_v57, 4 }
0x13d7   :  { %1116 = vrot.lane.b32.xlu1 %v1115_v58, %s1890_s5 }
0x1449   :  { %v1117_v59 = vpop.permute.xlu1 %1116 }
0x144a   :  { %v1119_v60 = vsel %vm1113_vm4, %v1117_v59, %v992_v27 }
0x144b   :  { %1671 = vmatmul.mubr.msk.f32.vlgmr.msra.gmra.mrb[10].mxu1 %vm63_vm2, %v1119_v60 }
0x144c   :  { %1700 = vmatprep.mubr.msk.f32.mxu1 %vm1886_vm0, %v1887_v6  ;;  %v1233_v6 = vsel %vm1232_vm5, 1, %v1888_v7  ;;  %v1247_v7 = vld [vmem:[%s2244_s6 + $0x18] sm:$0xff]  ;;  %1777 = vmatpush3.bf16.msra.mxu1 %v1776_v21 }
0x144d   :  { %v1773_v16 = vpack.c.bf16 %v1247_v7, %v1246_v10  ;;  %1778 = vmatprep.subr.bf16.mxu1 %v1885_v3 }
0x144f   :  { %1774 = vmatpush3.bf16.msra.mxu0 %v1773_v16 }
0x1450   :  { %1780 = vmatpush3.bf16.msra.mxu1 %v1779_v24 }
0x1451   :  { %1781 = vmatprep.subr.bf16.mxu1 %v1885_v3 }
0x1454   :  { %1783 = vmatpush3.bf16.msra.mxu1 %v1782_v28 }
0x1455   :  { %1784 = vmatprep.subr.bf16.mxu1 %v1885_v3  ;;  %v1461_v3 = vld [vmem:[%s2245_s7] ss:$0 sm:$0xff] }
0x1458   :  { %1786 = vmatpush3.bf16.msra.mxu1 %v1785_v36 }
0x151e   :  { %v1195_v61 = vpop.f32.mrb[10].mxu1 }
0x151f   :  { %v1200_v62 = vrot.slane %v1195_v61, 2  ;;  %v1672_v63 = vpop.f32.mrb[11].mxu1 }
0x1521   :  { %v1202_v0 = vadd.f32 %v1200_v62, %v2063_v53  ;;  %v1213_v53 = vpop.permute.xlu0 %1212 }
0x1523   :  { %1853 = vtanh.f32 %v1202_v0  ;;  %v1460_v2 = vmul.f32 -1.442695, %v1202_v0 }
0x1525   :  { %1855 = vpow2.f32 %v1460_v2 }
0x152d   :  { %v1854_v1 = vpop.eup %1853 }
0x152e   :  { %1217 = vrot.lane.b32.xlu1 %v1854_v1, %s1889_s25 }
0x152f   :  { %v1856_v4 = vpop.eup %1855 }
0x1530   :  { %v1206_v5 = vadd.f32 1.0, %v1856_v4 }
0x1532   :  { %1857 = vrcp.f32 %v1206_v5 }
0x153c   :  { %v1858_v8 = vpop.eup %1857 }
0x153d   :  { %v1215_v11 = vmul.f32 %v1858_v8, %v1213_v53 }
0x15a0   :  { %v1218_v22 = vpop.permute.xlu1 %1217 }
0x15a1   :  { %v1220_v9 = vmul.f32 %v1858_v8, %v1218_v22 }
0x15a3   :  { %1222 = vrot.lane.b32.xlu1 %v1220_v9, %s1890_s5 }
0x15a7   :  { %1235 = vperm.xlu1 %1796, %v1233_v6  }
0x1615   :  { %v1223_v12 = vpop.permute.xlu1 %1222 }
0x1616   :  { %v1225_v13 = vadd.f32 %v1223_v12, %v1215_v11 }
0x1618   :  { %1859 = vtanh.f32 %v1225_v13 }
0x1622   :  { %v1860_v17 = vpop.eup %1859 }
0x1623   :  { %1228 = vrot.lane.b32.xlu0 %v1860_v17, %s1889_s25 }
0x1626   :  { %v1236_v31 = vpop.permute.xlu1 %1235 }
0x1627   :  { %vm1237_vm0 = vcmp.eq.s32.totalorder %v1236_v31, 1 }
0x1695   :  { %v1229_v27 = vpop.permute.xlu0 %1228 }
0x1696   :  { %v1231_v29 = vmul.f32 %v1858_v8, %v1229_v27 }
0x1698   :  { %v1239_v30 = vrot.slane %v1231_v29, 6 }
0x169a   :  { %1240 = vrot.lane.b32.xlu0 %v1239_v30, %s1890_s5 }
0x170c   :  { %v1241_v32 = vpop.permute.xlu0 %1240 }
0x170d   :  { %v1243_v33 = vsel %vm1237_vm0, %v1241_v32, %v1119_v60 }
0x170e   :  { %1682 = vmatmul.mubr.msk.f32.vlgmr.msra.gmra.mrb[20].mxu0 %vm63_vm2, %v1243_v33  ;;  %vm1418_vm2 = vcmask 123904  }
0x17e1   :  { %v1324_v37 = vpop.f32.mrb[20].mxu0 }
0x17e2   :  { %v1325_v38 = vadd.f32 %v1461_v3, %v1324_v37  ;;  %v1683_v39 = vpop.f32.mrb[21].mxu0 }
0x17e4   :  { %v1328_v40 = vmax.f32 %v1325_v38, 0.0 }
0x17e6   :  { %1701 = vmatmul.mubr.msk.f32.vlgmr.msra.gmra.mrb[12].mxu1 %vm1344_vm6, %v1328_v40 }
0x18b9   :  { %v1414_v42 = vpop.f32.mrb[12].mxu1 }
0x18ba   :  { %v1415_v43 = vadd.f32 %v1463_v41, %v1414_v42  ;;  %v1702_v44 = vpop.f32.mrb[13].mxu1 }
0x18bc   :  { %1419 = vst.msk [vmem:[#allocation2] sm:$0x3] %vm1418_vm2, %v1415_v43 }
0x18bd   :  { %1872 = shalt.err (!%p1869_p4)
}
0x18be   :  { %s1873_s29 = scalar_lea.hbm %s2248_s10, 32 }
0x18bf   :  { %p1874_p5 = scmp.ne.s32.totalorder %s2248_s10, %s1873_s29  ;;  %p1877_p6 = scmp.lt.u32.totalorder %s1873_s29, %s2248_s10 }
0x18c1   :  { %p1879_p7 = pnand %p1877_p6, %p1874_p5 }
0x18c3   :  { %1882 = shalt.err (!%p1879_p7)
}
0x18c4   :  { %1429 = dma.vmem_to_hbm [thread:$0]  %s1427_s0, 32, %s2248_s10, [#allocation3]  }
0x18c5   :  { %1883 = dma.done.wait [#allocation3], 32  }
0x18c6   :  { %1884 = vsyncadd [#allocation3], 4294967264 }
0x18c7   :  { %1433 = vsyncpa [#allocation3], 1 }

</bundles_post_ra>
